<compile_context>
chip_gen: v7x
topology: tpu7x:2x2x1
jax: 0.10.0
libtpu: 0.0.40
codegen_flags: <defaults>
</compile_context>

<pallas_src>
import functools

import jax
import jax.numpy as jnp
from jax import lax
from jax.experimental import pallas as pl
from jax.experimental.pallas import tpu as pltpu

K = 7            # spatial-attention conv kernel size
P = K // 2       # padding = 3
REDUCTION = 16   # channel-attention reduction ratio
LANE = 128


def _dual_attention_kernel(x_ref, ma_ref, mm_ref, cb_ref, wc_ref, bc_ref,
                           o_ref, *, hw_true):
    """One grid step: a (TB, C, HWp) block, lane axis = HWp (multiple of 128)."""
    x = x_ref[...].astype(jnp.float32)                     # (TB, C, HWp)
    tb, c, hwp = x.shape
    inv_c = 1.0 / c
    inv_hw = 1.0 / hw_true

    # ---------------- Spatial attention ----------------
    avg_sp = jnp.sum(x, axis=1) * inv_c                    # (TB, HWp) mean over C
    max_sp = jnp.max(x, axis=1)                            # (TB, HWp) max  over C
    # 7x7 conv (in=2, out=1, pad=3) as two accumulated MXU matmuls against the
    # precomputed banded matrices (bf16 weights, f32 accumulation).
    att = jnp.dot(avg_sp.astype(jnp.bfloat16), ma_ref[...],
                  preferred_element_type=jnp.float32)
    att = att + jnp.dot(max_sp.astype(jnp.bfloat16), mm_ref[...],
                        preferred_element_type=jnp.float32)
    att = jax.nn.sigmoid(att + cb_ref[0])                  # (TB, HWp)

    # ---------------- Channel attention ----------------
    xs = x * att[:, None, :]                               # (TB, C, HWp)
    avg_ch = jnp.sum(xs, axis=2) * inv_hw                  # (TB, C) true-HW mean
    if hwp != hw_true:                                     # mask padded lanes
        lane = lax.broadcasted_iota(jnp.int32, xs.shape, 2)
        xs = jnp.where(lane < hw_true, xs, -jnp.inf)
    max_ch = jnp.max(xs, axis=2)                           # (TB, C)

    # Fused fc2(fc1(.)) — linear (no activation in the PyTorch module), so
    # mlp(avg)+mlp(max) == (avg+max) @ W_comb + b_comb.
    y = jnp.dot(avg_ch + max_ch, wc_ref[...],
                preferred_element_type=jnp.float32)
    scale = jax.nn.sigmoid(y + bc_ref[...])                # (TB, C)

    # Recompute x*att at the store instead of keeping xs live through the MLP.
    o_ref[...] = (x * att[:, None, :] * scale[:, :, None]).astype(o_ref.dtype)


def _build_spatial_conv_matrices(conv_w, H, W, hw_pad):
    """Banded matrices M_avg, M_max (hw_pad, hw_pad) such that, for flattened
    (H*W) maps, avg_flat @ M_avg + max_flat @ M_max reproduces
    conv2d(cat([avg, max]), conv_w, stride=1, padding=K//2) flattened."""
    HW = H * W
    p = jnp.arange(HW)
    i = p // W
    j = p % W
    cw = conv_w.astype(jnp.float32)
    mats = []
    for c in range(2):
        m = jnp.zeros((hw_pad, hw_pad), jnp.float32)
        for di in range(K):
            for dj in range(K):
                ii = i + (di - P)
                jj = j + (dj - P)
                valid = (ii >= 0) & (ii < H) & (jj >= 0) & (jj < W)
                rows = jnp.where(valid, ii * W + jj, 0)
                vals = jnp.where(valid, cw[c, di, dj], 0.0)
                m = m.at[rows, p].add(vals)
        mats.append(m.astype(jnp.bfloat16))                # bf16 MXU weights
    return mats[0], mats[1]


def _vmem_capacity_bytes():
    try:
        return int(pltpu.get_tpu_info().vmem_capacity_bytes)
    except Exception:
        return 64 * 1024 * 1024   # conservative (v7x-sized) fallback


def _pick_tb(batch, per_item_bytes, budget_bytes, min_grid_steps=4):
    """Largest divisor of `batch` that fits the budget AND keeps at least
    min(batch, min_grid_steps) grid steps (feeds both v7x TCs + pipelining)."""
    cap = max(1, budget_bytes // max(1, per_item_bytes))
    max_tb = max(1, batch // min(batch, min_grid_steps))
    tb = int(min(batch, cap, max_tb))
    while batch % tb:
        tb -= 1
    return tb


def dual_attention(x, conv_w, conv_b, w1, b1, w2, b2, *, tb=None):
    """x: (B, C, H, W) in its native dtype.  conv_w: (2, K, K), conv_b: (1,),
    w1: (C//r, C), b1: (C//r,), w2: (C, C//r), b2: (C,)."""
    B, C, H, W = x.shape
    HW = H * W
    hw_pad = ((HW + LANE - 1) // LANE) * LANE

    vmem_cap = _vmem_capacity_bytes()
    big_vmem = vmem_cap >= 100 * 1024 * 1024          # v5e/v6e (128 MiB) vs v7x (64 MiB)
    block_budget = (48 if big_vmem else 20) * 1024 * 1024
    vmem_cap_limit = (96 if big_vmem else 44) * 1024 * 1024
    hw_limit = 2048 if big_vmem else 1024
    if hw_pad > hw_limit:
        # TODO(synk): for large H*W the O(HW^2) conv-as-matmul matrices no
        # longer fit VMEM; a pltpu.roll-based 49-tap conv on the tiny (TB, HW)
        # avg/max maps (or a banded matmul) is needed instead.
        raise NotImplementedError("H*W too large for the conv-as-matmul path")

    m_avg, m_max = _build_spatial_conv_matrices(conv_w, H, W, hw_pad)
    cb = conv_b.reshape(1).astype(jnp.float32)                       # SMEM scalar
    w_comb = (jnp.transpose(w1) @ jnp.transpose(w2)).astype(jnp.float32)   # (C, C)
    b_comb = (2.0 * (b1 @ jnp.transpose(w2) + b2)).reshape(1, C).astype(jnp.float32)

    x_flat = x.reshape(B, C, HW)                      # keep native dtype (bf16 ok)
    if hw_pad != HW:
        x_flat = jnp.pad(x_flat, ((0, 0), (0, 0), (0, hw_pad - HW)))

    itemsize = x.dtype.itemsize
    # per batch item: 2x(in) + 2x(out) pipeline buffers + ~3 f32 temporaries
    per_item = 4 * C * hw_pad * itemsize + 3 * C * hw_pad * 4
    if tb is None:
        tb = _pick_tb(B, per_item, block_budget)
    assert B % tb == 0, "tb must divide the batch size"

    # TODO(synk): the grid-invariant operands (M_avg, M_max, W_comb, b_comb)
    # could be single-buffered via pipeline_mode=pl.Buffered(1); kept default
    # double-buffering here for compile robustness and accounted for instead.
    const_bytes = 2 * (2 * hw_pad * hw_pad * 2 + C * C * 4 + C * 4)
    need = tb * per_item + const_bytes + 4 * 1024 * 1024
    vmem_limit = int(min(vmem_cap_limit, max(32 * 1024 * 1024, need)))

    kernel = functools.partial(_dual_attention_kernel, hw_true=HW)

    out = pl.pallas_call(
        kernel,
        out_shape=jax.ShapeDtypeStruct((B, C, hw_pad), x.dtype),
        grid=(B // tb,),
        in_specs=[
            pl.BlockSpec((tb, C, hw_pad), lambda b: (b, 0, 0)),     # x (flattened)
            pl.BlockSpec((hw_pad, hw_pad), lambda b: (0, 0)),       # M_avg (bf16)
            pl.BlockSpec((hw_pad, hw_pad), lambda b: (0, 0)),       # M_max (bf16)
            pl.BlockSpec(memory_space=pltpu.MemorySpace.SMEM),      # conv bias (1,)
            pl.BlockSpec((C, C), lambda b: (0, 0)),                 # fused MLP weight
            pl.BlockSpec((1, C), lambda b: (0, 0)),                 # fused MLP bias
        ],
        out_specs=pl.BlockSpec((tb, C, hw_pad), lambda b: (b, 0, 0)),
        compiler_params=pltpu.CompilerParams(
            dimension_semantics=("parallel",),
            vmem_limit_bytes=vmem_limit),
    )(x_flat, m_avg, m_max, cb, w_comb, b_comb)

    if hw_pad != HW:
        out = out[:, :, :HW]
    return out.reshape(B, C, H, W)


def dual_attention_reference(x, conv_w, conv_b, w1, b1, w2, b2):
    """Pure-JAX reference mirroring the PyTorch module exactly (NCHW)."""
    # SpatialAttention
    avg = jnp.mean(x, axis=1, keepdims=True)
    mx = jnp.max(x, axis=1, keepdims=True)
    cat = jnp.concatenate([avg, mx], axis=1)                        # (B, 2, H, W)
    att = lax.conv_general_dilated(
        cat, conv_w.reshape(1, 2, K, K), (1, 1), ((P, P), (P, P)),
        dimension_numbers=("NCHW", "OIHW", "NCHW")) + conv_b.reshape(1, 1, 1, 1)
    xs = x * jax.nn.sigmoid(att)
    # ChannelAttention (note: NO activation between fc1 and fc2, per the module)
    avg_c = jnp.mean(xs, axis=(2, 3))                               # (B, C)
    max_c = jnp.max(xs, axis=(2, 3))                                # (B, C)

    def mlp(v):
        return (v @ w1.T + b1) @ w2.T + b2

    scale = jax.nn.sigmoid(mlp(avg_c) + mlp(max_c))                 # (B, C)
    return xs * scale[:, :, None, None]


if __name__ == "__main__":
    B, C, H, W = 8, 32, 16, 16          # in_channels must be >= reduction ratio
    hidden = C // REDUCTION             # = 2

    key = jax.random.PRNGKey(0)
    ks = jax.random.split(key, 7)
    x = jax.random.normal(ks[0], (B, C, H, W), jnp.float32)
    conv_w = jax.random.normal(ks[1], (2, K, K), jnp.float32) * 0.1
    conv_b = jax.random.normal(ks[2], (1,), jnp.float32) * 0.1
    w1 = jax.random.normal(ks[3], (hidden, C), jnp.float32) * 0.1
    b1 = jax.random.normal(ks[4], (hidden,), jnp.float32) * 0.1
    w2 = jax.random.normal(ks[5], (C, hidden), jnp.float32) * 0.1
    b2 = jax.random.normal(ks[6], (C,), jnp.float32) * 0.1

    out = dual_attention(x, conv_w, conv_b, w1, b1, w2, b2)
    out = jax.block_until_ready(out)

    ref = dual_attention_reference(x, conv_w, conv_b, w1, b1, w2, b2)
    ref = jax.block_until_ready(ref)

    assert out.shape == (B, C, H, W)
    assert out.dtype == x.dtype
    assert bool(jnp.allclose(out, ref, atol=1e-2, rtol=1e-2)), "mismatch vs reference"
    print("KERNEL_OK")
</pallas_src>

<mosaic_0001>
module attributes {stable_mosaic.version = 11 : i64} {
  func.func @_dual_attention_kernel(%arg0: i32, %arg1: memref<2x32x256xf32, #tpu.memory_space<vmem>>, %arg2: memref<256x256xbf16, #tpu.memory_space<vmem>>, %arg3: memref<256x256xbf16, #tpu.memory_space<vmem>>, %arg4: memref<1xf32, #tpu.memory_space<smem>>, %arg5: memref<32x32xf32, #tpu.memory_space<vmem>>, %arg6: memref<1x32xf32, #tpu.memory_space<vmem>>, %arg7: memref<2x32x256xf32, #tpu.memory_space<vmem>>) attributes {dimension_semantics = [#tpu.dimension_semantics<parallel>], iteration_bounds = array<i64: 4>, scalar_prefetch = 0 : i64, scratch_operands = 0 : i64, tpu.core_type = #tpu.core_type<tc>, window_params = [{transform_indices = @transform_0, window_bounds = array<i64: 2, 32, 256>}, {pipeline_mode = #tpu.pipeline_mode<synchronous>, transform_indices = @transform_1, window_bounds = array<i64: 256, 256>}, {pipeline_mode = #tpu.pipeline_mode<synchronous>, transform_indices = @transform_2, window_bounds = array<i64: 256, 256>}, {transform_indices = @transform_3, window_bounds = array<i64: 1>}, {pipeline_mode = #tpu.pipeline_mode<synchronous>, transform_indices = @transform_4, window_bounds = array<i64: 32, 32>}, {pipeline_mode = #tpu.pipeline_mode<synchronous>, transform_indices = @transform_5, window_bounds = array<i64: 1, 32>}, {transform_indices = @transform_6, window_bounds = array<i64: 2, 32, 256>}]} {
    %c0 = arith.constant 0 : index
    %c0_0 = arith.constant 0 : index
    %c0_1 = arith.constant 0 : index
    %0 = vector.load %arg1[%c0, %c0_0, %c0_1] : memref<2x32x256xf32, #tpu.memory_space<vmem>>, vector<2x32x256xf32>
    %cst = arith.constant dense<0.000000e+00> : vector<2x256xf32>
    %1 = vector.multi_reduction <add>, %0, %cst [1] : vector<2x32x256xf32> to vector<2x256xf32>
    %cst_2 = arith.constant 3.125000e-02 : f32
    %2 = vector.broadcast %cst_2 : f32 to vector<2x256xf32>
    %3 = arith.mulf %1, %2 : vector<2x256xf32>
    %cst_3 = arith.constant dense<0xFF800000> : vector<2x256xf32>
    %4 = vector.multi_reduction <maximumf>, %0, %cst_3 [1] : vector<2x32x256xf32> to vector<2x256xf32>
    %5 = arith.truncf %3 : vector<2x256xf32> to vector<2x256xbf16>
    %c0_4 = arith.constant 0 : index
    %c0_5 = arith.constant 0 : index
    %6 = vector.load %arg2[%c0_4, %c0_5] : memref<256x256xbf16, #tpu.memory_space<vmem>>, vector<256x256xbf16>
    %cst_6 = arith.constant dense<0.000000e+00> : vector<2x256xf32>
    %7 = tpu.matmul %5, %6, %cst_6 {dimension_numbers = #tpu.dot_dimension_numbers<[1], [0], [0], [1], [0, 0, 1, 1], [], []>} : vector<2x256xbf16>, vector<256x256xbf16>, vector<2x256xf32> -> vector<2x256xf32>
    %8 = arith.truncf %4 : vector<2x256xf32> to vector<2x256xbf16>
    %c0_7 = arith.constant 0 : index
    %c0_8 = arith.constant 0 : index
    %9 = vector.load %arg3[%c0_7, %c0_8] : memref<256x256xbf16, #tpu.memory_space<vmem>>, vector<256x256xbf16>
    %cst_9 = arith.constant dense<0.000000e+00> : vector<2x256xf32>
    %10 = tpu.matmul %8, %9, %cst_9 {dimension_numbers = #tpu.dot_dimension_numbers<[1], [0], [0], [1], [0, 0, 1, 1], [], []>} : vector<2x256xbf16>, vector<256x256xbf16>, vector<2x256xf32> -> vector<2x256xf32>
    %11 = arith.addf %7, %10 : vector<2x256xf32>
    %c0_10 = arith.constant 0 : index
    %12 = memref.load %arg4[%c0_10] : memref<1xf32, #tpu.memory_space<smem>>
    %13 = vector.broadcast %12 : f32 to vector<2x256xf32>
    %14 = arith.addf %11, %13 : vector<2x256xf32>
    %15 = arith.negf %14 : vector<2x256xf32>
    %16 = math.exp %15 : vector<2x256xf32>
    %cst_11 = arith.constant 1.000000e+00 : f32
    %17 = vector.broadcast %cst_11 : f32 to vector<2x256xf32>
    %18 = arith.addf %17, %16 : vector<2x256xf32>
    %19 = arith.divf %17, %18 : vector<2x256xf32>
    %20 = vector.shape_cast %19 : vector<2x256xf32> to vector<2x1x256xf32>
    %21 = vector.broadcast %20 : vector<2x1x256xf32> to vector<2x32x256xf32>
    %22 = arith.mulf %0, %21 : vector<2x32x256xf32>
    %cst_12 = arith.constant dense<0.000000e+00> : vector<2x32xf32>
    %23 = vector.multi_reduction <add>, %22, %cst_12 [2] : vector<2x32x256xf32> to vector<2x32xf32>
    %cst_13 = arith.constant 3.906250e-03 : f32
    %24 = vector.broadcast %cst_13 : f32 to vector<2x32xf32>
    %25 = arith.mulf %23, %24 : vector<2x32xf32>
    %cst_14 = arith.constant dense<0xFF800000> : vector<2x32xf32>
    %26 = vector.multi_reduction <maximumf>, %22, %cst_14 [2] : vector<2x32x256xf32> to vector<2x32xf32>
    %27 = arith.addf %25, %26 : vector<2x32xf32>
    %c0_15 = arith.constant 0 : index
    %c0_16 = arith.constant 0 : index
    %28 = vector.load %arg5[%c0_15, %c0_16] : memref<32x32xf32, #tpu.memory_space<vmem>>, vector<32x32xf32>
    %cst_17 = arith.constant dense<0.000000e+00> : vector<2x32xf32>
    %29 = tpu.matmul %27, %28, %cst_17 {dimension_numbers = #tpu.dot_dimension_numbers<[1], [0], [0], [1], [0, 0, 1, 1], [], []>} : vector<2x32xf32>, vector<32x32xf32>, vector<2x32xf32> -> vector<2x32xf32>
    %c0_18 = arith.constant 0 : index
    %c0_19 = arith.constant 0 : index
    %30 = vector.load %arg6[%c0_18, %c0_19] : memref<1x32xf32, #tpu.memory_space<vmem>>, vector<1x32xf32>
    %31 = vector.broadcast %30 : vector<1x32xf32> to vector<2x32xf32>
    %32 = arith.addf %29, %31 : vector<2x32xf32>
    %33 = arith.negf %32 : vector<2x32xf32>
    %34 = math.exp %33 : vector<2x32xf32>
    %cst_20 = arith.constant 1.000000e+00 : f32
    %35 = vector.broadcast %cst_20 : f32 to vector<2x32xf32>
    %36 = arith.addf %35, %34 : vector<2x32xf32>
    %37 = arith.divf %35, %36 : vector<2x32xf32>
    %38 = vector.shape_cast %19 : vector<2x256xf32> to vector<2x1x256xf32>
    %39 = vector.broadcast %38 : vector<2x1x256xf32> to vector<2x32x256xf32>
    %40 = arith.mulf %0, %39 : vector<2x32x256xf32>
    %41 = vector.shape_cast %37 : vector<2x32xf32> to vector<2x32x1xf32>
    %42 = vector.broadcast %41 : vector<2x32x1xf32> to vector<2x32x256xf32>
    %43 = arith.mulf %40, %42 : vector<2x32x256xf32>
    %c0_21 = arith.constant 0 : index
    %c0_22 = arith.constant 0 : index
    %c0_23 = arith.constant 0 : index
    %44 = vector.load %arg7[%c0_21, %c0_22, %c0_23] : memref<2x32x256xf32, #tpu.memory_space<vmem>>, vector<2x32x256xf32>
    tpu.vector_store %arg7[%c0_21, %c0_22, %c0_23], %43 {strides = array<i32>} : memref<2x32x256xf32, #tpu.memory_space<vmem>>, vector<2x32x256xf32>,
    return
  }
  func.func @transform_0(%arg0: i32) -> (i32, i32, i32) {
    %c0_i32 = arith.constant 0 : i32
    %c0_i32_0 = arith.constant 0 : i32
    %c0_i32_1 = arith.constant 0 : i32
    return %arg0, %c0_i32, %c0_i32_0 : i32, i32, i32
  }
  func.func @transform_1(%arg0: i32) -> (i32, i32) {
    %c0_i32 = arith.constant 0 : i32
    %c0_i32_0 = arith.constant 0 : i32
    %c0_i32_1 = arith.constant 0 : i32
    return %c0_i32, %c0_i32_0 : i32, i32
  }
  func.func @transform_2(%arg0: i32) -> (i32, i32) {
    %c0_i32 = arith.constant 0 : i32
    %c0_i32_0 = arith.constant 0 : i32
    %c0_i32_1 = arith.constant 0 : i32
    return %c0_i32, %c0_i32_0 : i32, i32
  }
  func.func @transform_3(%arg0: i32) -> i32 {
    %c0_i32 = arith.constant 0 : i32
    %c0_i32_0 = arith.constant 0 : i32
    return %c0_i32 : i32
  }
  func.func @transform_4(%arg0: i32) -> (i32, i32) {
    %c0_i32 = arith.constant 0 : i32
    %c0_i32_0 = arith.constant 0 : i32
    %c0_i32_1 = arith.constant 0 : i32
    return %c0_i32, %c0_i32_0 : i32, i32
  }
  func.func @transform_5(%arg0: i32) -> (i32, i32) {
    %c0_i32 = arith.constant 0 : i32
    %c0_i32_0 = arith.constant 0 : i32
    %c0_i32_1 = arith.constant 0 : i32
    return %c0_i32, %c0_i32_0 : i32, i32
  }
  func.func @transform_6(%arg0: i32) -> (i32, i32, i32) {
    %c0_i32 = arith.constant 0 : i32
    %c0_i32_0 = arith.constant 0 : i32
    %c0_i32_1 = arith.constant 0 : i32
    return %arg0, %c0_i32, %c0_i32_0 : i32, i32, i32
  }
}

</mosaic_0001>

<bundles_post_ra>
// kernel: tpu_custom_call.1
= control target key start
LH: loop header
LB: loop body
LE: loop exit
PB: predicated region body
PF: predicated region fallthrough
CT: control target
= control target key end

     0   :  { %s2437_s0 = inlined_call_operand.hbm [shape: f32[8,32,256], index: 0, kind: input, shape index: {}]   ;;  %s2438_s1 = inlined_call_operand.hbm [shape: bf16[256,256], index: 1, kind: input, shape index: {}]   ;;  %s2439_s2 = inlined_call_operand.hbm [shape: bf16[256,256], index: 2, kind: input, shape index: {}]   ;;  %s2440_s3 = inlined_call_operand.<no memory space> [shape: f32[1], index: 3, kind: input, shape index: {}]   ;;  %s2441_s4 = inlined_call_operand.hbm [shape: f32[32,32], index: 4, kind: input, shape index: {}]   ;;  %s2442_s5 = inlined_call_operand.vmem [shape: f32[1,32], index: 5, kind: input, shape index: {}]   ;;  %s2443_s6 = inlined_call_operand.hbm [shape: f32[8,32,256], index: 6, kind: output, shape index: {}]  }
   0x1   :  { %11 = sst [smem:[#allocation2]] %s2440_s3 }
   0x2   :  { %12 = vsyncpa [#allocation4], 0 }
   0x3   :  { %14 = vsyncpa [#allocation4 + $0x1], 0 }
   0x4   :  { %15 = vsyncpa [#allocation7], 0 }
   0x5   :  { %16 = vsyncpa [#allocation10], 0 }
   0x6   :  { %17 = vsyncpa [#allocation5], 0 }
   0x7   :  { %19 = vsyncpa [#allocation5 + $0x1], 0  ;;  %s1941_s23 = smov 0   ;;  %s1943_s24 = smov 0  }
   0x8   :  { %s1945_s25 = smov 0   ;;  %s1947_s26 = smov 0  }
   0x9 LB: > { %s1962_s3 = sadd.s32 4294967295, %s1886_s26   ;;  %s1386_s27 = sadd.s32 4294967294, %s1886_s26   ;;  %s1886_s26 = sphi %s1947_s26, %s2465_s26   ;;  %s1882_s25 = sphi %s1945_s25, %s2464_s25   ;;  %s1878_s24 = sphi %s1943_s24, %s2463_s24   ;;  %s1874_s23 = sphi %s1941_s23, %s2462_s23  }
   0xa   : > { %p45_p0 = scmp.ne.s32.totalorder %s1878_s24, %s1874_s23  ;;  %p2444_p1 = scmp.eq.s32.totalorder %s1962_s3, 0 }
   0xb   : > { %p180_p3 = scmp.eq.s32.totalorder %s1386_s27, 3  ;;  %p1387_p5 = scmp.ge.s32.totalorder %s1886_s26, 1 }
   0xc   : > { %p1971_p4 = por %p2444_p1, %p45_p0  ;;  %p187_p7 = scmp.lt.s32.totalorder %s1886_s26, 5 }
   0xd   : > { %p1976_p6 = por %p180_p3, %p45_p0  ;;  %s1888_s7 = smov [#allocation6]  }
   0xe   : > { %s2447_s28 = scalar_select %p1971_p4, 1, 0 }
   0xf   : > { %s2448_s29 = scalar_select %p1976_p6, 1, 0 }
  0x10   : > { %p1981_p8 = pnand %p1387_p5, %p187_p7  ;;  %s199_s8 = sshll.u32 %s1888_s7, 4  ;;  %s1985_s8 = int_to_ptr.vmem [resolvable:$true] %s199_s8 }
  0x11   : > { %s1889_s10 = smov [#allocation8]   ;;  %s1890_s12 = smov [#allocation9]  }
  0x12   : > { %s2449_s30 = scalar_select %p1981_p8, 1, 0 }
  0x13   : > { %p1519_p9 = pneg %p1981_p8  ;;  %s212_s11 = sshll.u32 %s1889_s10, 4  ;;  %s1995_s11 = int_to_ptr.vmem [resolvable:$true] %s212_s11 }
  0x14   : > { %s1997_s13 = sshll.u32 %s1890_s12, 4  ;;  %s1698_s16 = scalar_lea.hbm %s2438_s1, 4096  ;;  %s229_s13 = int_to_ptr.vmem [resolvable:$true] %s1997_s13 }
  0x15   : > { %p1991_p10 = pnand %p1519_p9, %p2444_p1  ;;  %p1699_p11 = scmp.ne.s32.totalorder %s2438_s1, %s1698_s16 }
  0x16   : > { %p1705_p3 = scmp.lt.u32.totalorder %s1698_s16, %s2438_s1 }
  0x17   : > { %p2007_p12 = pneg %p1991_p10 }
  0x19   : > { %p1701_p13 = pnand %p2007_p12, %p1699_p11 }
  0x1b   : > { %p1702_p0 = pneg %p1701_p13 }
  0x1d   : > { %p1707_p5 = pnand %p1705_p3, %p1702_p0 }
  0x1f   : > { %1710 = shalt.err (!%p1707_p5)
}
  0x20   : > { %s1711_s22 = scalar_lea.vmem %s1985_s8, 4096  ;;  %p1719_p2 = scmp.lt.s32.totalorder %s1985_s8, %s1985_s8 }
  0x21   : > { %p1712_p7 = scmp.ne.s32.totalorder %s1985_s8, %s1711_s22  ;;  %p1720_p6 = scmp.lt.s32.totalorder %s1711_s22, %s1711_s22 }
  0x23   : > { %p1714_p9 = pnand %p1712_p7, %p2007_p12  ;;  %p1721_p11 = por %p1720_p6, %p1719_p2 }
  0x25   : > { %p1715_p1 = pneg %p1714_p9 }
  0x27   : > { %p1722_p13 = pnand %p1721_p11, %p1715_p1 }
  0x29   : > { %1725 = shalt.err (!%p1722_p13)
}
  0x2a   : > { %s1891_s27 = smov 128   ;;  %s1892_s7 = smov 8  }
  0x2b   : > { %1522 = dma.hbm_to_vmem [thread:$0]  (!%p1991_p10), %s2438_s1, 4096, %s1985_s8, [#allocation7], %s1891_s27, %s1891_s27, %s1892_s7  }
  0x2c   : > { %s1726_s16 = scalar_lea.hbm %s2439_s2, 4096 }
  0x2d   : > { %p1727_p1 = scmp.ne.s32.totalorder %s2439_s2, %s1726_s16  ;;  %p1733_p0 = scmp.lt.u32.totalorder %s1726_s16, %s2439_s2 }
  0x2f   : > { %p1729_p2 = pnand %p1727_p1, %p2007_p12 }
  0x31   : > { %p1730_p6 = pneg %p1729_p2 }
  0x33   : > { %p1735_p3 = pnand %p1733_p0, %p1730_p6 }
  0x35   : > { %1738 = shalt.err (!%p1735_p3)
}
  0x36   : > { %s1739_s8 = scalar_lea.vmem %s1995_s11, 4096  ;;  %p1747_p11 = scmp.lt.s32.totalorder %s1995_s11, %s1995_s11 }
  0x37   : > { %p1740_p5 = scmp.ne.s32.totalorder %s1995_s11, %s1739_s8  ;;  %p1748_p13 = scmp.lt.s32.totalorder %s1739_s8, %s1739_s8 }
  0x39   : > { %p1742_p7 = pnand %p1740_p5, %p2007_p12  ;;  %p1749_p1 = por %p1748_p13, %p1747_p11 }
  0x3b   : > { %p1743_p9 = pneg %p1742_p7 }
  0x3d   : > { %p1750_p2 = pnand %p1749_p1, %p1743_p9 }
  0x3f   : > { %1753 = shalt.err (!%p1750_p2)
}
  0x40   : > { %1525 = dma.hbm_to_vmem [thread:$0]  (!%p1991_p10), %s2439_s2, 4096, %s1995_s11, [#allocation7], %s1891_s27, %s1891_s27, %s1892_s7  }
  0x41   : > { %s1754_s15 = scalar_lea.hbm %s2441_s4, 512 }
  0x42   : > { %p1755_p6 = scmp.ne.s32.totalorder %s2441_s4, %s1754_s15  ;;  %p1761_p5 = scmp.lt.u32.totalorder %s1754_s15, %s2441_s4 }
  0x44   : > { %p1757_p0 = pnand %p1755_p6, %p2007_p12 }
  0x46   : > { %p1758_p3 = pneg %p1757_p0 }
  0x48   : > { %p1763_p7 = pnand %p1761_p5, %p1758_p3 }
  0x4a   : > { %1766 = shalt.err (!%p1763_p7)
}
  0x4b   : > { %s1767_s21 = scalar_lea.vmem %s229_s13, 512  ;;  %p1775_p1 = scmp.lt.s32.totalorder %s229_s13, %s229_s13 }
  0x4c   : > { %p1768_p9 = scmp.ne.s32.totalorder %s229_s13, %s1767_s21  ;;  %p1776_p2 = scmp.lt.s32.totalorder %s1767_s21, %s1767_s21 }
  0x4e   : > { %p1770_p11 = pnand %p1768_p9, %p2007_p12  ;;  %p1777_p4 = por %p1776_p2, %p1775_p1 }
  0x50   : > { %p1771_p13 = pneg %p1770_p11 }
  0x52   : > { %p1778_p8 = pnand %p1777_p4, %p1771_p13 }
  0x54   : > { %1781 = shalt.err (!%p1778_p8)
}
  0x55   : > { %1528 = dma.hbm_to_vmem [thread:$0]  (!%p1991_p10), %s2441_s4, 512, %s229_s13, [#allocation10], %s1891_s27, %s1891_s27, %s1892_s7  }
  0x56   : > { %s2080_s19 = sadd.s32 1, %s1886_s26   ;;  %s32_s22 = sadd.s32 1, %s1882_s25 }
  0x57   : > { %s29_s9 = ssub.s32 %s1886_s26, %s2080_s19  ;;  %p39_p8 = scmp.ne.s32.totalorder %s1882_s25, %s1878_s24 }
  0x58   : > { %p30_p4 = scmp.eq.s32.totalorder %s29_s9, 0  ;;  %p40_p12 = scmp.eq.s32.totalorder %s1886_s26, 0 }
  0x59   : > { %p1540_p6 = scmp.lt.s32.totalorder %s1886_s26, 4  ;;  %p2452_p3 = scmp.eq.s32.totalorder %s1962_s3, 3 }
  0x5a   : > { %s2090_s10 = scalar_select %p30_p4, %s1882_s25, %s32_s22  }
  0x5b   : > { %p41_p0 = por %p40_p12, %p39_p8  ;;  %p2094_p5 = por %p2452_p3, %p39_p8 }
  0x5c   : > { %s245_s14 = sand.u32 1, %s1882_s25   ;;  %s1478_s15 = sshll.u32 %s1886_s26, 11 }
  0x5d   : > { %s1392_s13 = sshll.u32 %s245_s14, 7  ;;  %s2103_s16 = scalar_lea.hbm %s2437_s0, %s1478_s15 }
  0x5e   : > { %s249_s17 = scalar_lea.vmem [#allocation3], %s1392_s13  ;;  %p2105_p10 = pnand %p1540_p6, %p41_p0 }
  0x5f   : > { %s257_s18 = sshll.u32 %s249_s17, 4  ;;  %s2111_s21 = scalar_lea.sflag [#allocation4], %s245_s14  ;;  %s2109_s18 = int_to_ptr.vmem [resolvable:$true] %s257_s18 }
  0x60   : > { %s1782_s11 = scalar_lea.hbm %s2103_s16, 2048  ;;  %p1784_p9 = pneg %p2105_p10 }
  0x61   : > { %p1783_p7 = scmp.ne.s32.totalorder %s2103_s16, %s1782_s11  ;;  %s1787_s22 = scalar_lea.hbm %s2437_s0, 8192 }
  0x62   : > { %p1788_p1 = scmp.lt.u32.totalorder %s2103_s16, %s2437_s0  ;;  %p1789_p2 = scmp.lt.u32.totalorder %s1787_s22, %s1782_s11 }
  0x63   : > { %p1785_p11 = pnand %p1784_p9, %p1783_p7  ;;  %p1791_p8 = scmp.lt.u32.totalorder %s1782_s11, %s2103_s16 }
  0x64   : > { %p1790_p4 = por %p1789_p2, %p1788_p1 }
  0x65   : > { %p1786_p13 = pneg %p1785_p11 }
  0x66   : > { %p1792_p12 = por %p1791_p8, %p1790_p4 }
  0x68   : > { %p1793_p6 = pnand %p1792_p12, %p1786_p13 }
  0x6a   : > { %1796 = shalt.err (!%p1793_p6)
}
  0x6b   : > { %s1797_s14 = scalar_lea.vmem %s2109_s18, 2048  ;;  %s1893_s27 = smov [#allocation3]  }
  0x6c   : > { %p1798_p0 = scmp.ne.s32.totalorder %s2109_s18, %s1797_s14  ;;  %s1802_s7 = sshll.u32 %s1893_s27, 4  ;;  %s1803_s7 = int_to_ptr.vmem [resolvable:$false] %s1802_s7 }
  0x6d   : > { %s1804_s17 = scalar_lea.vmem %s1803_s7, 4096  ;;  %p1805_p11 = scmp.lt.s32.totalorder %s2109_s18, %s1803_s7 }
  0x6e   : > { %p1800_p3 = pnand %p1798_p0, %p1784_p9  ;;  %p1806_p1 = scmp.lt.s32.totalorder %s1804_s17, %s1797_s14 }
  0x70   : > { %p1801_p7 = pneg %p1800_p3  ;;  %p1807_p2 = por %p1806_p1, %p1805_p11 }
  0x72   : > { %p1808_p4 = pnand %p1807_p2, %p1801_p7 }
  0x74   : > { %1811 = shalt.err (!%p1808_p4)
}
  0x75   : > { %s1894_s11 = smov 256   ;;  %s1895_s8 = smov 16  }
  0x76   : > { %1532 = dma.hbm_to_vmem [thread:$0]  (!%p2105_p10), %s2103_s16, 2048, %s2109_s18, %s2111_s21, %s1894_s11, %s1894_s11, %s1895_s8  }
  0x77   : > { %p2455_p9 = scmp.ne.s32.totalorder %s2449_s30, 0 }
  0x78   : > { %s2142_s9 = sand.u32 (!%p2455_p9), 1, %s1878_s24   ;;  %p2456_p13 = scmp.ne.s32.totalorder (!%p2455_p9), %s2447_s28, 0 }
  0x79   : > { %269 = sbr.rel (%p2455_p9) target bundleno = 1032 (0x408), region = 44  ;;  %s1397_s22 = sshll.u32 (!%p2455_p9), %s2142_s9, 7 }
  0x7a   : > { %s272_s15 = scalar_lea.sflag (!%p2455_p9), [#allocation4], %s2142_s9  ;;  %s2148_s13 = scalar_lea.vmem (!%p2455_p9), [#allocation3], %s1397_s22 }
  0x80   : > { %1857 = dma.done.wait (%p2456_p13), %s272_s15, 2048  }
  0x81   : > { %1859 = vsyncadd (%p2456_p13), %s272_s15, 4294965248  ;;  %p2457_p10 = scmp.eq.s32.totalorder %s1962_s3, 0 }
  0x83   : > { %1861 = dma.done.wait (%p2457_p10), [#allocation7], 8192   ;;  %p2458_p8 = pmov %p2457_p10 }
  0x85   : > { %1863 = vsyncadd (%p2458_p8), [#allocation7], 4294959104  ;;  %p2459_p12 = pmov %p2458_p8 }
  0x86   : > { %p2460_p6 = pmov %p2458_p8 }
  0x87   : > { %1865 = dma.done.wait (%p2459_p12), [#allocation10], 512  }
  0x88   : > { %1867 = vsyncadd (%p2460_p6), [#allocation10], 4294966784  ;;  %v1590_v0 = vld [vmem:[#allocation8 + $0x4] ss:$8 sps:$4 sm:$0xff]   ;;  %v1594_v2 = vld [vmem:[#allocation8] ss:$8 sps:$4 sm:$0xff]  }
  0x89   : > { %v1592_v1 = vld [vmem:[#allocation6 + $0x4] ss:$8 sps:$4 sm:$0xff]   ;;  %657 = vmatprep.subr.bf16.mxu0 %v1590_v0  ;;  %v1595_v3 = vld [vmem:[#allocation6] ss:$8 sps:$4 sm:$0xff]   ;;  %v1596_v4 = vld [vmem:[#allocation8 + $0x14] ss:$8 sps:$4 sm:$0xff]  }
  0x8a   : > { %872 = vmatprep.subr.bf16.mxu1 %v1592_v1  ;;  %658 = vmatpush1.bf16.msra.mxu0 %v1594_v2  ;;  %v1598_v5 = vld [vmem:[#allocation6 + $0x14] ss:$8 sps:$4 sm:$0xff]   ;;  %v1600_v6 = vld [vmem:[#allocation8 + $0x10] ss:$8 sps:$4 sm:$0xff]   ;;  %v1602_v8 = vld [vmem:[#allocation8 + $0x24] ss:$8 sps:$4 sm:$0xff]  }
  0x8b   : > { %873 = vmatpush1.bf16.msra.mxu1 %v1595_v3  ;;  %659 = vmatprep.subr.bf16.mxu0 %v1596_v4  ;;  %v1601_v7 = vld [vmem:[#allocation6 + $0x10] ss:$8 sps:$4 sm:$0xff]   ;;  %v1604_v9 = vld [vmem:[#allocation6 + $0x24] ss:$8 sps:$4 sm:$0xff]   ;;  %v1606_v10 = vld [vmem:[#allocation8 + $0x20] ss:$8 sps:$4 sm:$0xff]  }
  0x8c   : > { %874 = vmatprep.subr.bf16.mxu1 %v1598_v5  ;;  %v1607_v11 = vld [vmem:[#allocation6 + $0x20] ss:$8 sps:$4 sm:$0xff]   ;;  %v1608_v12 = vld [vmem:[#allocation8 + $0x34] ss:$8 sps:$4 sm:$0xff]   ;;  %v1612_v14 = vld [vmem:[#allocation8 + $0x30] ss:$8 sps:$4 sm:$0xff]  }
  0x8d   : > { %v1610_v13 = vld [vmem:[#allocation6 + $0x34] ss:$8 sps:$4 sm:$0xff]   ;;  %v1613_v15 = vld [vmem:[#allocation6 + $0x30] ss:$8 sps:$4 sm:$0xff]   ;;  %v1614_v16 = vld [vmem:[#allocation8 + $0x44] ss:$8 sps:$4 sm:$0xff]  }
  0x8e   : > { %660 = vmatpush1.bf16.msra.mxu0 %v1600_v6  ;;  %v1616_v17 = vld [vmem:[#allocation6 + $0x44] ss:$8 sps:$4 sm:$0xff]   ;;  %v1618_v18 = vld [vmem:[#allocation8 + $0x40] ss:$8 sps:$4 sm:$0xff]   ;;  %v1620_v20 = vld [vmem:[#allocation8 + $0x54] ss:$8 sps:$4 sm:$0xff]  }
  0x8f   : > { %875 = vmatpush1.bf16.msra.mxu1 %v1601_v7  ;;  %661 = vmatprep.subr.bf16.mxu0 %v1602_v8  ;;  %v1619_v19 = vld [vmem:[#allocation6 + $0x40] ss:$8 sps:$4 sm:$0xff]   ;;  %v1622_v21 = vld [vmem:[#allocation6 + $0x54] ss:$8 sps:$4 sm:$0xff]   ;;  %v1624_v22 = vld [vmem:[#allocation8 + $0x50] ss:$8 sps:$4 sm:$0xff]  }
  0x90   : > { %876 = vmatprep.subr.bf16.mxu1 %v1604_v9  ;;  %v1625_v23 = vld [vmem:[#allocation6 + $0x50] ss:$8 sps:$4 sm:$0xff]   ;;  %v1626_v24 = vld [vmem:[#allocation8 + $0x64] ss:$8 sps:$4 sm:$0xff]   ;;  %v1630_v26 = vld [vmem:[#allocation8 + $0x60] ss:$8 sps:$4 sm:$0xff]  }
  0x91   : > { %v1628_v25 = vld [vmem:[#allocation6 + $0x64] ss:$8 sps:$4 sm:$0xff]   ;;  %v1631_v27 = vld [vmem:[#allocation6 + $0x60] ss:$8 sps:$4 sm:$0xff]   ;;  %v1632_v28 = vld [vmem:[#allocation8 + $0x74] ss:$8 sps:$4 sm:$0xff]  }
  0x92   : > { %662 = vmatpush1.bf16.msra.mxu0 %v1606_v10  ;;  %v1634_v29 = vld [vmem:[#allocation6 + $0x74] ss:$8 sps:$4 sm:$0xff]   ;;  %v1636_v30 = vld [vmem:[#allocation8 + $0x70] ss:$8 sps:$4 sm:$0xff]   ;;  %v1638_v32 = vld [vmem:[#allocation8 + $0x84] ss:$8 sps:$4 sm:$0xff]  }
  0x93   : > { %877 = vmatpush1.bf16.msra.mxu1 %v1607_v11  ;;  %663 = vmatprep.subr.bf16.mxu0 %v1608_v12  ;;  %v1637_v31 = vld [vmem:[#allocation6 + $0x70] ss:$8 sps:$4 sm:$0xff]   ;;  %v1640_v33 = vld [vmem:[#allocation6 + $0x84] ss:$8 sps:$4 sm:$0xff]   ;;  %v1642_v34 = vld [vmem:[#allocation8 + $0x80] ss:$8 sps:$4 sm:$0xff]  }
  0x94   : > { %878 = vmatprep.subr.bf16.mxu1 %v1610_v13  ;;  %v1643_v35 = vld [vmem:[#allocation6 + $0x80] ss:$8 sps:$4 sm:$0xff]   ;;  %v1644_v36 = vld [vmem:[#allocation8 + $0x94] ss:$8 sps:$4 sm:$0xff]   ;;  %v1648_v38 = vld [vmem:[#allocation8 + $0x90] ss:$8 sps:$4 sm:$0xff]  }
  0x95   : > { %v1646_v37 = vld [vmem:[#allocation6 + $0x94] ss:$8 sps:$4 sm:$0xff]   ;;  %v1649_v39 = vld [vmem:[#allocation6 + $0x90] ss:$8 sps:$4 sm:$0xff]   ;;  %v1650_v40 = vld [vmem:[#allocation8 + $0xa4] ss:$8 sps:$4 sm:$0xff]  }
  0x96   : > { %664 = vmatpush1.bf16.msra.mxu0 %v1612_v14  ;;  %v1652_v41 = vld [vmem:[#allocation6 + $0xa4] ss:$8 sps:$4 sm:$0xff]   ;;  %v1654_v42 = vld [vmem:[#allocation8 + $0xa0] ss:$8 sps:$4 sm:$0xff]   ;;  %v1656_v44 = vld [vmem:[#allocation8 + $0xb4] ss:$8 sps:$4 sm:$0xff]  }
  0x97   : > { %879 = vmatpush1.bf16.msra.mxu1 %v1613_v15  ;;  %665 = vmatprep.subr.bf16.mxu0 %v1614_v16  ;;  %v1655_v43 = vld [vmem:[#allocation6 + $0xa0] ss:$8 sps:$4 sm:$0xff]   ;;  %v1658_v45 = vld [vmem:[#allocation6 + $0xb4] ss:$8 sps:$4 sm:$0xff]   ;;  %v1660_v46 = vld [vmem:[#allocation8 + $0xb0] ss:$8 sps:$4 sm:$0xff]  }
  0x98   : > { %880 = vmatprep.subr.bf16.mxu1 %v1616_v17  ;;  %v1661_v47 = vld [vmem:[#allocation6 + $0xb0] ss:$8 sps:$4 sm:$0xff]   ;;  %v2163_v48 = vld [vmem:[%s2148_s13 + $0x8] sm:$0xff]  ;;  %v2192_v61 = vld [vmem:[%s2148_s13] sm:$0xff]  ;;  %vm490_vm0 = vcmask 1041409   ;;  %s913_s28 = sld [smem:[#allocation2]] }
  0x99   : > { %v1662_v49 = vld [vmem:[#allocation8 + $0xc4] ss:$8 sps:$4 sm:$0xff]   ;;  %v2166_v51 = vld [vmem:[%s2148_s13 + $0x18] sm:$0xff]  ;;  %v2195_v62 = vld [vmem:[%s2148_s13 + $0x10] sm:$0xff]  ;;  %vm1898_vm1 = vmmov 0   ;;  %vm1084_vm2 = vcmask 130112  }
  0x9a   : > { %666 = vmatpush1.bf16.msra.mxu0 %v1618_v18  ;;  %v1664_v50 = vld [vmem:[#allocation6 + $0xc4] ss:$8 sps:$4 sm:$0xff]   ;;  %v2175_v54 = vld [vmem:[%s2148_s13 + $0x58] sm:$0xff]  ;;  %v383_v56 = vmax.f32 %v2163_v48, %v2166_v51  ;;  %v343_v57 = vadd.f32 %v2166_v51, %v2163_v48  ;;  %v374_v2 = vmax.f32 %v2192_v61, %v2195_v62  ;;  %v334_v3 = vadd.f32 %v2195_v62, %v2192_v61  ;;  %v1666_v4 = vld [vmem:[#allocation8 + $0xc0] ss:$8 sps:$4 sm:$0xff]   ;;  %s2357_s18 = scalar_lea.vmem [#allocation11], %s1397_s22 }
  0x9b   : > { %881 = vmatpush1.bf16.msra.mxu1 %v1619_v19  ;;  %667 = vmatprep.subr.bf16.mxu0 %v1620_v20  ;;  %v2169_v52 = vld [vmem:[%s2148_s13 + $0x28] sm:$0xff]  ;;  %v2185_v58 = vld [vmem:[%s2148_s13 + $0x38] sm:$0xff]  ;;  %v2209_v7 = vld [vmem:[%s2148_s13 + $0x20] sm:$0xff]  ;;  %vm1091_vm3 = vcmask 195712   ;;  %vm1098_vm4 = vcmask 261312   ;;  %vm1120_vm5 = vcmask 261120  }
  0x9c   : > { %882 = vmatprep.subr.bf16.mxu1 %v1622_v21  ;;  %v2172_v53 = vld [vmem:[%s2148_s13 + $0x48] sm:$0xff]  ;;  %v2198_v63 = vld [vmem:[%s2148_s13 + $0x78] sm:$0xff]  ;;  %v384_v0 = vmax.f32 %v383_v56, %v2169_v52  ;;  %v344_v1 = vadd.f32 %v343_v57, %v2169_v52  ;;  %v2214_v11 = vld [vmem:[%s2148_s13 + $0x40] sm:$0xff]  ;;  %v375_v13 = vmax.f32 %v374_v2, %v2209_v7  ;;  %s1480_s20 = sshll.u32 %s1962_s3, 11  ;;  %s1284_s21 = sshll.u32 %s2357_s18, 4  ;;  %s2390_s21 = int_to_ptr.vmem [resolvable:$true] %s1284_s21 }
  0x9d   : > { %v2178_v55 = vld [vmem:[%s2148_s13 + $0x68] sm:$0xff]  ;;  %v401_v59 = vmax.f32 %v2172_v53, %v2175_v54  ;;  %v361_v60 = vadd.f32 %v2175_v54, %v2172_v53  ;;  %v2217_v12 = vld [vmem:[%s2148_s13 + $0x50] sm:$0xff]  ;;  %s2388_s7 = scalar_lea.hbm %s2443_s6, %s1480_s20  ;;  %s1270_s3 = scalar_lea.sflag [#allocation5], %s2142_s9 }
  0x9e   : > { %668 = vmatpush1.bf16.msra.mxu0 %v1624_v22  ;;  %v1667_v8 = vld [vmem:[#allocation6 + $0xc0] ss:$8 sps:$4 sm:$0xff]   ;;  %v385_v9 = vmax.f32 %v384_v0, %v2185_v58  ;;  %v345_v10 = vadd.f32 %v344_v1, %v2185_v58  ;;  %v1668_v14 = vld [vmem:[#allocation8 + $0xd4] ss:$8 sps:$4 sm:$0xff]   ;;  %v392_v19 = vmax.f32 %v2214_v11, %v2217_v12  ;;  %s1812_s17 = scalar_lea.vmem %s2390_s21, 2048  ;;  %s1900_s11 = smov [#allocation11]  }
  0x9f   : > { %883 = vmatpush1.bf16.msra.mxu1 %v1625_v23  ;;  %669 = vmatprep.subr.bf16.mxu0 %v1626_v24  ;;  %v402_v5 = vmax.f32 %v401_v59, %v2178_v55  ;;  %v362_v6 = vadd.f32 %v361_v60, %v2178_v55  ;;  %v1670_v15 = vld [vmem:[#allocation6 + $0xd4] ss:$8 sps:$4 sm:$0xff]   ;;  %v2228_v22 = vld [vmem:[%s2148_s13 + $0x60] sm:$0xff]  ;;  %v335_v24 = vadd.f32 %v334_v3, %v2209_v7  ;;  %p1813_p0 = scmp.ne.s32.totalorder %s2390_s21, %s1812_s17  ;;  %s1816_s8 = sshll.u32 %s1900_s11, 4  ;;  %s1817_s8 = int_to_ptr.vmem [resolvable:$false] %s1816_s8 }
  0xa0   : > { %884 = vmatprep.subr.bf16.mxu1 %v1628_v25  ;;  %v2223_v18 = vld [vmem:[%s2148_s13 + $0x30] sm:$0xff]  ;;  %v386_v20 = vrot.slane %v385_v9, 4  ;;  %v346_v21 = vrot.slane %v345_v10, 4  ;;  %v1679_v56 = vld [vmem:[#allocation6 + $0xe0] ss:$8 sps:$4 sm:$0xff]   ;;  %s1818_s22 = scalar_lea.vmem %s1817_s8, 4096  ;;  %p1819_p11 = scmp.lt.s32.totalorder %s2390_s21, %s1817_s8 }
  0xa1   : > { %v403_v16 = vmax.f32 %v402_v5, %v2198_v63  ;;  %v363_v17 = vadd.f32 %v362_v6, %v2198_v63  ;;  %v376_v23 = vmax.f32 %v375_v13, %v2223_v18  ;;  %v1680_v1 = vld [vmem:[#allocation8 + $0xf4] ss:$8 sps:$4 sm:$0xff]   ;;  %p1814_p3 = pnand %p1813_p0, %p2094_p5  ;;  %p1820_p1 = scmp.lt.s32.totalorder %s1818_s22, %s1812_s17 }
  0xa2   : > { %670 = vmatpush1.bf16.msra.mxu0 %v1630_v26  ;;  %v1682_v2 = vld [vmem:[#allocation6 + $0xf4] ss:$8 sps:$4 sm:$0xff]  }
  0xa3   : > { %885 = vmatpush1.bf16.msra.mxu1 %v1631_v27  ;;  %671 = vmatprep.subr.bf16.mxu0 %v1632_v28  ;;  %v404_v25 = vrot.slane %v403_v16, 4  ;;  %v364_v26 = vrot.slane %v363_v17, 4  ;;  %v393_v27 = vmax.f32 %v392_v19, %v2228_v22  ;;  %v352_v28 = vadd.f32 %v2217_v12, %v2214_v11  ;;  %v1685_v19 = vld [vmem:[#allocation6 + $0xf0] ss:$8 sps:$4 sm:$0xff]   ;;  %p1815_p7 = pneg %p1814_p3  ;;  %p1821_p2 = por %p1820_p1, %p1819_p11 }
  0xa4   : > { %886 = vmatprep.subr.bf16.mxu1 %v1634_v29  ;;  %v1672_v29 = vld [vmem:[#allocation8 + $0xd0] ss:$8 sps:$4 sm:$0xff]  }
  0xa5   : > { %p1822_p4 = pnand %p1821_p2, %p1815_p7 }
  0xa6   : > { %672 = vmatpush1.bf16.msra.mxu0 %v1636_v30  ;;  %v1673_v30 = vld [vmem:[#allocation6 + $0xd0] ss:$8 sps:$4 sm:$0xff]  }
  0xa7   : > { %887 = vmatpush1.bf16.msra.mxu1 %v1637_v31  ;;  %673 = vmatprep.subr.bf16.mxu0 %v1638_v32  ;;  %v387_v31 = vmax.f32 %v385_v9, %v386_v20  ;;  %v347_v32 = vadd.f32 %v346_v21, %v345_v10 }
  0xa8   : > { %888 = vmatprep.subr.bf16.mxu1 %v1640_v33  ;;  %v2236_v33 = vld [vmem:[%s2148_s13 + $0x70] sm:$0xff] }
  0xaa   : > { %674 = vmatpush1.bf16.msra.mxu0 %v1642_v34  ;;  %v377_v34 = vrot.slane %v376_v23, 4 }
  0xab   : > { %889 = vmatpush1.bf16.msra.mxu1 %v1643_v35  ;;  %675 = vmatprep.subr.bf16.mxu0 %v1644_v36  ;;  %v336_v35 = vadd.f32 %v335_v24, %v2223_v18  ;;  %v1674_v36 = vld [vmem:[#allocation8 + $0xe4] ss:$8 sps:$4 sm:$0xff]  }
  0xac   : > { %890 = vmatprep.subr.bf16.mxu1 %v1646_v37  ;;  %v1676_v37 = vld [vmem:[#allocation6 + $0xe4] ss:$8 sps:$4 sm:$0xff]  }
  0xae   : > { %676 = vmatpush1.bf16.msra.mxu0 %v1648_v38  ;;  %v405_v38 = vmax.f32 %v403_v16, %v404_v25 }
  0xaf   : > { %891 = vmatpush1.bf16.msra.mxu1 %v1649_v39  ;;  %677 = vmatprep.subr.bf16.mxu0 %v1650_v40  ;;  %v365_v39 = vadd.f32 %v364_v26, %v363_v17  ;;  %v394_v40 = vmax.f32 %v393_v27, %v2236_v33  ;;  %v1684_v17 = vld [vmem:[#allocation8 + $0xf0] ss:$8 sps:$4 sm:$0xff]  }
  0xb0   : > { %892 = vmatprep.subr.bf16.mxu1 %v1652_v41  ;;  %v388_v41 = vrot.slane %v387_v31, 2 }
  0xb2   : > { %678 = vmatpush1.bf16.msra.mxu0 %v1654_v42  ;;  %v348_v42 = vrot.slane %v347_v32, 2  ;;  %v389_v57 = vmax.f32 %v387_v31, %v388_v41 }
  0xb3   : > { %893 = vmatpush1.bf16.msra.mxu1 %v1655_v43  ;;  %679 = vmatprep.subr.bf16.mxu0 %v1656_v44  ;;  %v378_v43 = vmax.f32 %v376_v23, %v377_v34  ;;  %v337_v44 = vrot.slane %v336_v35, 4 }
  0xb4   : > { %894 = vmatprep.subr.bf16.mxu1 %v1658_v45  ;;  %v406_v45 = vrot.slane %v405_v38, 2  ;;  %v349_v59 = vadd.f32 %v348_v42, %v347_v32  ;;  %v390_v6 = vrot.slane %v389_v57, 1 }
  0xb5   : > { %v379_v60 = vrot.slane %v378_v43, 2  ;;  %v338_v0 = vadd.f32 %v337_v44, %v336_v35 }
  0xb6   : > { %680 = vmatpush1.bf16.msra.mxu0 %v1660_v46  ;;  %v366_v46 = vrot.slane %v365_v39, 2  ;;  %v407_v3 = vmax.f32 %v405_v38, %v406_v45  ;;  %v391_v20 = vmax.f32 %v389_v57, %v390_v6 }
  0xb7   : > { %895 = vmatpush1.bf16.msra.mxu1 %v1661_v47  ;;  %681 = vmatprep.subr.bf16.mxu0 %v1662_v49  ;;  %v395_v47 = vrot.slane %v394_v40, 4  ;;  %v353_v49 = vadd.f32 %v352_v28, %v2228_v22  ;;  %v380_v9 = vmax.f32 %v378_v43, %v379_v60  ;;  %v339_v10 = vrot.slane %v338_v0, 2 }
  0xb8   : > { %896 = vmatprep.subr.bf16.mxu1 %v1664_v50  ;;  %v1678_v50 = vld [vmem:[#allocation8 + $0xe0] ss:$8 sps:$4 sm:$0xff]   ;;  %v408_v13 = vrot.slane %v407_v3, 1 }
  0xb9   : > { %v396_v5 = vmax.f32 %v394_v40, %v395_v47  ;;  %v354_v16 = vadd.f32 %v353_v49, %v2236_v33  ;;  %v381_v23 = vrot.slane %v380_v9, 1  ;;  %v340_v24 = vadd.f32 %v339_v10, %v338_v0 }
  0xba   : > { %682 = vmatpush1.bf16.msra.mxu0 %v1666_v4  ;;  %v367_v4 = vadd.f32 %v366_v46, %v365_v39  ;;  %v409_v25 = vmax.f32 %v407_v3, %v408_v13 }
  0xbb   : > { %897 = vmatpush1.bf16.msra.mxu1 %v1667_v8  ;;  %683 = vmatprep.subr.bf16.mxu0 %v1668_v14  ;;  %v350_v8 = vrot.slane %v349_v59, 1  ;;  %v355_v28 = vrot.slane %v354_v16, 4  ;;  %v382_v31 = vmax.f32 %v380_v9, %v381_v23  ;;  %v341_v32 = vrot.slane %v340_v24, 1 }
  0xbc   : > { %898 = vmatprep.subr.bf16.mxu1 %v1670_v15  ;;  %v368_v14 = vrot.slane %v367_v4, 1  ;;  %v397_v15 = vrot.slane %v396_v5, 2  ;;  %v449_v34 = vpack.c.bf16 %v409_v25, %v409_v25 }
  0xbd   : > { %v351_v21 = vadd.f32 %v350_v8, %v349_v59  ;;  %v446_v40 = vpack.c.bf16 %v382_v31, %v382_v31  ;;  %v342_v41 = vadd.f32 %v341_v32, %v340_v24  ;;  %v914_v24 = vstv %s913_s28 }
  0xbe   : > { %684 = vmatpush1.bf16.msra.mxu0 %v1672_v29  ;;  %v369_v26 = vadd.f32 %v368_v14, %v367_v4  ;;  %v398_v27 = vmax.f32 %v396_v5, %v397_v15  ;;  %v447_v29 = vpack.c.bf16 %v391_v20, %v391_v20  ;;  %v489_v42 = vunpack.c.l.b16 %v449_v34 }
  0xbf   : > { %899 = vmatpush1.bf16.msra.mxu1 %v1673_v30  ;;  %685 = vmatprep.subr.bf16.mxu0 %v1674_v36  ;;  %v371_v30 = vmul.f32 0.03125, %v351_v21  ;;  %v486_v47 = vunpack.c.l.b16 %v446_v40  ;;  %v370_v49 = vmul.f32 0.03125, %v342_v41  ;;  %v935_v41 = vlaneseq }
  0xc0   : > { %900 = vmatprep.subr.bf16.mxu1 %v1676_v37  ;;  %v373_v35 = vmul.f32 0.03125, %v369_v26  ;;  %v399_v36 = vrot.slane %v398_v27, 1  ;;  %v356_v37 = vadd.f32 %v355_v28, %v354_v16  ;;  %v487_v38 = vunpack.c.l.b16 %v447_v29 }
  0xc1   : > { %v411_v39 = vpack.c.bf16 %v371_v30, %v371_v30  ;;  %v410_v6 = vpack.c.bf16 %v370_v49, %v370_v49 }
  0xc2   : > { %686 = vmatpush1.bf16.msra.mxu0 %v1678_v50  ;;  %v413_v43 = vpack.c.bf16 %v373_v35, %v373_v35  ;;  %v400_v44 = vmax.f32 %v398_v27, %v399_v36  ;;  %v357_v45 = vrot.slane %v356_v37, 2  ;;  %v492_v50 = vsel %vm490_vm0, %v489_v42, %v487_v38 }
  0xc3   : > { %901 = vmatpush1.bf16.msra.mxu1 %v1679_v56  ;;  %687 = vmatprep.subr.bf16.mxu0 %v1680_v1  ;;  %v703_v46 = vunpack.c.l.b16 %v411_v39  ;;  %v494_v60 = vpack.c.b16 %v492_v50, %v492_v50  ;;  %v702_v13 = vunpack.c.l.b16 %v410_v6  ;;  %v1896_v39 = vmov 1966171168  }
  0xc4   : > { %902 = vmatprep.subr.bf16.mxu1 %v1682_v2  ;;  %v705_v56 = vunpack.c.l.b16 %v413_v43  ;;  %v448_v57 = vpack.c.bf16 %v400_v44, %v400_v44  ;;  %v358_v59 = vadd.f32 %v357_v45, %v356_v37  ;;  %v933_v40 = vunpack.c.l.s4 %v1896_v39 }
  0xc5   : > { %689 = vmatprep.mubr.bf16.mxu0 %v494_v60  ;;  %v2247_v43 = vshrl.u32 %v935_v41, 7 }
  0xc6   : > { %688 = vmatpush1.bf16.msra.mxu0 %v1684_v17  ;;  %v707_v0 = vsel %vm490_vm0, %v705_v56, %v703_v46  ;;  %v488_v1 = vunpack.c.l.b16 %v448_v57  ;;  %v359_v2 = vrot.slane %v358_v59, 1  ;;  %v934_v42 = vunpack.c.0.s8 %v933_v40 }
  0xc7   : > { %903 = vmatpush1.bf16.msra.mxu1 %v1685_v19  ;;  %v709_v3 = vpack.c.b16 %v707_v0, %v707_v0  ;;  %v2251_v50 = vsub.s32 0, %v2247_v43  ;;  %v2254_v56 = vsub.s32 1, %v2247_v43 }
  0xc8   : > { %v491_v4 = vsel %vm490_vm0, %v488_v1, %v486_v47  ;;  %v360_v5 = vadd.f32 %v359_v2, %v358_v59  ;;  %v937_v45 = vsub.s32 %v934_v42, %v2247_v43 }
  0xc9   : > { %904 = vmatprep.mubr.bf16.mxu1 %v709_v3  ;;  %v493_v8 = vpack.c.b16 %v491_v4, %v491_v4 }
  0xca   : > { %v372_v9 = vmul.f32 0.03125, %v360_v5 }
  0xcb   : > { %690 = vmatmul.mubr.bf16.vlgmr.msra.gmra.mrb[0].mxu0 %v493_v8 }
  0xcc   : > { %v412_v10 = vpack.c.bf16 %v372_v9, %v372_v9 }
  0xce   : > { %v704_v14 = vunpack.c.l.b16 %v412_v10 }
  0xd0   : > { %v706_v15 = vsel %vm490_vm0, %v704_v14, %v702_v13 }
  0xd1   : > { %v708_v16 = vpack.c.b16 %v706_v15, %v706_v15 }
  0xd3   : > { %905 = vmatmul.mubr.bf16.vlgmr.msra.gmra.mrb[0].mxu1 %v708_v16 }
 0x19e   : > { %v691_v17 = vpop.f32.mrb[0].mxu0 }
 0x19f   : > { %v693_v19 = vpop.f32.mrb[1].mxu0 }
 0x1a0   : > { %v695_v20 = vpop.f32.mrb[2].mxu0 }
 0x1a1   : > { %v696_v21 = vpop.f32.mrb[3].mxu0 }
 0x1a6   : > { %v906_v23 = vpop.f32.mrb[0].mxu1 }
 0x1a7   : > { %v907_v25 = vadd.f32 %v906_v23, %v691_v17  ;;  %v908_v26 = vpop.f32.mrb[1].mxu1 }
 0x1a8   : > { %v909_v27 = vadd.f32 %v908_v26, %v693_v19  ;;  %v910_v28 = vpop.f32.mrb[2].mxu1  ;;  %v1055_v26 = vld [vmem:[#allocation9 + $0x8] sm:$0xff] }
 0x1a9   : > { %v915_v29 = vadd.f32 %v914_v24, %v907_v25  ;;  %v911_v30 = vpop.f32.mrb[3].mxu1  ;;  %v1054_v25 = vld [vmem:[#allocation9] sm:$0xff] }
 0x1aa   : > { %v916_v31 = vadd.f32 %v914_v24, %v909_v27  ;;  %v1897_v27 = vmov 0.0|0.0   ;;  %v1498_v28 = vpack.c.bf16 %v1055_v26, %v1054_v25  ;;  %v1057_v30 = vld [vmem:[#allocation9 + $0x18] sm:$0xff] }
 0x1ab   : > { %v1466_v32 = vmul.f32 -1.442695, %v915_v29  ;;  %1497 = vmatprep.subr.bf16.mxu0 %v1897_v27  ;;  %v1056_v29 = vld [vmem:[#allocation9 + $0x10] sm:$0xff] }
 0x1ac   : > { %v1467_v34 = vmul.f32 -1.442695, %v916_v31  ;;  %1499 = vmatpush3.bf16.msra.mxu0 %v1498_v28  ;;  %v1501_v31 = vpack.c.bf16 %v1057_v30, %v1056_v29 }
 0x1ad   : > { %1686 = vpow2.f32 %v1466_v32  ;;  %1500 = vmatprep.subr.bf16.mxu0 %v1897_v27  ;;  %v1899_v32 = vmov 0.0  }
 0x1ae   : > { %1688 = vpow2.f32 %v1467_v34  ;;  %1494 = vmatprep.mubr.msk.f32.mxu0 %vm1898_vm1, %v1899_v32 }
 0x1b0   : > { %1502 = vmatpush3.bf16.msra.mxu0 %v1501_v31 }
 0x1b7   : > { %v1687_v35 = vpop.eup %1686 }
 0x1b8   : > { %v1689_v36 = vpop.eup %1688  ;;  %v923_v37 = vadd.f32 1.0, %v1687_v35 }
 0x1b9   : > { %v924_v38 = vadd.f32 1.0, %v1689_v36 }
 0x1ba   : > { %1690 = vrcp.f32 %v923_v37 }
 0x1bb   : > { %1692 = vrcp.f32 %v924_v38 }
 0x1c4   : > { %v1691_v44 = vpop.eup %1690 }
 0x1c5   : > { %v1693_v46 = vpop.eup %1692 }
 0x1c6   : > { %v931_v47 = vcombine.low %v1691_v44, %v1693_v46  ;;  %v1074_v46 = vand.u32 127, %v935_v41 }
 0x1c8   : > { %v938_v49 = vrot.slane %v931_v47, %v937_v45  ;;  %v1086_v47 = vadd.s32 4294967280, %v1074_v46 }
 0x1ca   : > { %v946_v57 = vrot.slane %v938_v49, %v937_v45  ;;  %v939_v59 = vcombine.high %v938_v49, %v938_v49 }
 0x1cc   : > { %v957_v60 = vrot.slane %v946_v57, %v2251_v50  ;;  %v961_v0 = vrot.slane %v946_v57, %v2254_v56  ;;  %v953_v1 = vrot.slane %v939_v59, %v937_v45 }
 0x1ce   : > { %v2259_v2 = vmul.f32 %v957_v60, %v2195_v62  ;;  %v2262_v3 = vmul.f32 %v961_v0, %v2166_v51  ;;  %v2265_v4 = vmul.f32 %v957_v60, %v2192_v61  ;;  %v2268_v5 = vmul.f32 %v961_v0, %v2163_v48 }
 0x1cf   : > { %v965_v6 = vrot.slane %v953_v1, %v2251_v50  ;;  %v969_v8 = vrot.slane %v953_v1, %v2254_v56  ;;  %v2283_v48 = vmul.f32 %v957_v60, %v2209_v7  ;;  %v2286_v61 = vmul.f32 %v961_v0, %v2169_v52 }
 0x1d0   : > { %v1025_v9 = vmax.f32 %v2259_v2, %v2262_v3  ;;  %v990_v62 = vadd.f32 %v2268_v5, %v2265_v4  ;;  %v993_v13 = vadd.f32 %v2262_v3, %v2259_v2  ;;  %v2301_v52 = vmul.f32 %v957_v60, %v2223_v18 }
 0x1d1   : > { %v2277_v10 = vmul.f32 %v965_v6, %v2214_v11  ;;  %v2280_v51 = vmul.f32 %v969_v8, %v2172_v53  ;;  %v2293_v11 = vmul.f32 %v965_v6, %v2217_v12  ;;  %v2296_v53 = vmul.f32 %v969_v8, %v2175_v54 }
 0x1d2   : > { %1026 = vmax.xlane.f32.xlu1 %v1025_v9  ;;  %991 = vadd.xlane.f32.xlu0 %v990_v62  ;;  %v996_v7 = vadd.f32 %v2286_v61, %v2283_v48  ;;  %v2306_v16 = vmul.f32 %v961_v0, %v2185_v58  ;;  %v2309_v12 = vmul.f32 %v965_v6, %v2228_v22  ;;  %v1079_v60 = vadd.s32 4294967288, %v1074_v46 }
 0x1d3   : > { %v1002_v14 = vadd.f32 %v2280_v51, %v2277_v10  ;;  %v1005_v15 = vadd.f32 %v2296_v53, %v2293_v11  ;;  %v2312_v54 = vmul.f32 %v969_v8, %v2178_v55  ;;  %v2319_v19 = vmul.f32 %v965_v6, %v2236_v33 }
 0x1d4   : > { %v999_v17 = vadd.f32 %v2306_v16, %v2301_v52  ;;  %v2322_v58 = vmul.f32 %v969_v8, %v2198_v63  ;;  %v1022_v55 = vmax.f32 %v2265_v4, %v2268_v5  ;;  %v1028_v20 = vmax.f32 %v2283_v48, %v2286_v61 }
 0x1d5   : > { %v1008_v18 = vadd.f32 %v2312_v54, %v2309_v12  ;;  %v1037_v33 = vmax.f32 %v2293_v11, %v2296_v53  ;;  %v1034_v63 = vmax.f32 %v2277_v10, %v2280_v51  ;;  %v1040_v21 = vmax.f32 %v2309_v12, %v2312_v54 }
 0x1d6   : > { %994 = vadd.xlane.f32.xlu0 %v993_v13  ;;  %1003 = vadd.xlane.f32.xlu1 %v1002_v14  ;;  %v1011_v22 = vadd.f32 %v2322_v58, %v2319_v19  ;;  %v1031_v23 = vmax.f32 %v2301_v52, %v2306_v16  ;;  %v1043_v24 = vmax.f32 %v2319_v19, %v2322_v58  ;;  %v1093_v9 = vadd.s32 4294967272, %v1074_v46 }
 0x1d7   : > { %v1077_v8 = vsub.s32 %v1074_v46, %v2247_v43 }
 0x1da   : > { %997 = vadd.xlane.f32.xlu0 %v996_v7  ;;  %1006 = vadd.xlane.f32.xlu1 %v1005_v15  ;;  %v1089_v15 = vsub.s32 %v1086_v47, %v2247_v43 }
 0x1de   : > { %1000 = vadd.xlane.f32.xlu0 %v999_v17  ;;  %1009 = vadd.xlane.f32.xlu1 %v1008_v18 }
 0x1e2   : > { %1023 = vmax.xlane.f32.xlu0 %v1022_v55  ;;  %1012 = vadd.xlane.f32.xlu1 %v1011_v22  ;;  %v1082_v55 = vsub.s32 %v1079_v60, %v2247_v43 }
 0x1e6   : > { %1029 = vmax.xlane.f32.xlu0 %v1028_v20  ;;  %1038 = vmax.xlane.f32.xlu1 %v1037_v33 }
 0x1ea   : > { %1035 = vmax.xlane.f32.xlu0 %v1034_v63  ;;  %1041 = vmax.xlane.f32.xlu1 %v1040_v21  ;;  %v1096_v21 = vsub.s32 %v1093_v9, %v2247_v43 }
 0x1ee   : > { %1032 = vmax.xlane.f32.xlu0 %v1031_v23  ;;  %1044 = vmax.xlane.f32.xlu1 %v1043_v24 }
 0x25f   : > { %v1027_v34 = vpop.xlane.xlu1 %1026  ;;  %v992_v35 = vpop.xlane.xlu0 %991 }
 0x260   : > { %v1014_v59 = vmul.f32 0.00390625, %v992_v35 }
 0x263   : > { %v995_v36 = vpop.xlane.xlu0 %994  ;;  %v1004_v37 = vpop.xlane.xlu1 %1003 }
 0x264   : > { %v1015_v0 = vmul.f32 0.00390625, %v995_v36  ;;  %v1018_v62 = vmul.f32 0.00390625, %v1004_v37 }
 0x266   : > { %v1047_v22 = vadd.f32 %v1027_v34, %v1015_v0 }
 0x267   : > { %v998_v38 = vpop.xlane.xlu0 %997  ;;  %v1007_v39 = vpop.xlane.xlu1 %1006 }
 0x268   : > { %v1019_v1 = vmul.f32 0.00390625, %v1007_v39  ;;  %v1016_v6 = vmul.f32 0.00390625, %v998_v38  ;;  %v1083_v31 = vrot.slane %v1047_v22, %v1082_v55 }
 0x26b   : > { %v1001_v40 = vpop.xlane.xlu0 %1000  ;;  %v1010_v42 = vpop.xlane.xlu1 %1009 }
 0x26c   : > { %v1020_v13 = vmul.f32 0.00390625, %v1010_v42  ;;  %v1017_v63 = vmul.f32 0.00390625, %v1001_v40 }
 0x26f   : > { %v1024_v44 = vpop.xlane.xlu0 %1023  ;;  %v1013_v45 = vpop.xlane.xlu1 %1012 }
 0x270   : > { %v1046_v14 = vadd.f32 %v1024_v44, %v1014_v59  ;;  %v1021_v24 = vmul.f32 0.00390625, %v1013_v45  ;;  %v1468_v45 = vld [vmem:[%s2442_s5] ss:$0 sm:$0xff] }
 0x272   : > { %v1078_v23 = vrot.slane %v1046_v14, %v1077_v8 }
 0x273   : > { %v1030_v49 = vpop.xlane.xlu0 %1029  ;;  %v1039_v57 = vpop.xlane.xlu1 %1038 }
 0x274   : > { %v1051_v7 = vadd.f32 %v1039_v57, %v1019_v1  ;;  %v1048_v17 = vadd.f32 %v1030_v49, %v1016_v6  ;;  %v1085_v34 = vsel %vm1084_vm2, %v1083_v31, %v1078_v23 }
 0x276   : > { %v1107_v25 = vrot.slane %v1051_v7, %v1082_v55  ;;  %v1090_v27 = vrot.slane %v1048_v17, %v1089_v15 }
 0x277   : > { %v1036_v18 = vpop.xlane.xlu0 %1035  ;;  %v1042_v41 = vpop.xlane.xlu1 %1041 }
 0x278   : > { %v1050_v20 = vadd.f32 %v1036_v18, %v1018_v62  ;;  %v1052_v33 = vadd.f32 %v1042_v41, %v1020_v13  ;;  %v1092_v39 = vsel %vm1091_vm3, %v1090_v27, %v1085_v34 }
 0x27a   : > { %v1103_v26 = vrot.slane %v1050_v20, %v1077_v8  ;;  %v1112_v28 = vrot.slane %v1052_v33, %v1089_v15 }
 0x27b   : > { %v1033_v29 = vpop.xlane.xlu0 %1032  ;;  %v1045_v30 = vpop.xlane.xlu1 %1044 }
 0x27c   : > { %v1108_v32 = vsel %vm1084_vm2, %v1107_v25, %v1103_v26  ;;  %v1049_v35 = vadd.f32 %v1033_v29, %v1017_v63  ;;  %v1053_v36 = vadd.f32 %v1045_v30, %v1021_v24 }
 0x27d   : > { %v1113_v43 = vsel %vm1091_vm3, %v1112_v28, %v1108_v32 }
 0x27e   : > { %v1097_v37 = vrot.slane %v1049_v35, %v1096_v21  ;;  %v1117_v38 = vrot.slane %v1053_v36, %v1096_v21 }
 0x280   : > { %v1099_v40 = vsel %vm1098_vm4, %v1097_v37, %v1092_v39  ;;  %v1118_v42 = vsel %vm1098_vm4, %v1117_v38, %v1113_v43 }
 0x281   : > { %v1119_v44 = vsel %vm490_vm0, %v1118_v42, %v1099_v40 }
 0x282   : > { %1495 = vmatmul.mubr.msk.f32.vlgmr.msra.gmra.mrb[4].mxu0 %vm1120_vm5, %v1119_v44 }
 0x355   : > { %v1189_v46 = vpop.f32.mrb[4].mxu0 }
 0x356   : > { %v1190_v47 = vadd.f32 %v1468_v45, %v1189_v46  ;;  %v1496_v49 = vpop.f32.mrb[5].mxu0 }
 0x358   : > { %v1470_v57 = vmul.f32 -1.442695, %v1190_v47 }
 0x35a   : > { %1694 = vpow2.f32 %v1470_v57 }
 0x364   : > { %v1695_v59 = vpop.eup %1694 }
 0x365   : > { %v1196_v60 = vadd.f32 1.0, %v1695_v59 }
 0x367   : > { %1696 = vrcp.f32 %v1196_v60 }
 0x371   : > { %v1697_v0 = vpop.eup %1696 }
 0x372   : > { %v1202_v1 = vrot.slane %v1697_v0, %v2251_v50  ;;  %v1221_v6 = vrot.slane %v1697_v0, %v2254_v56 }
 0x374   : > { %1208 = vbcast.lane.b32.xlu1 %v1202_v1, 264  ;;  %1204 = vbcast.lane.b32.xlu0 %v1202_v1, 256 }
 0x378   : > { %1212 = vbcast.lane.b32.xlu1 %v1202_v1, 272  ;;  %1223 = vbcast.lane.b32.xlu0 %v1221_v6, 256 }
 0x37c   : > { %1216 = vbcast.lane.b32.xlu1 %v1202_v1, 280  ;;  %1231 = vbcast.lane.b32.xlu0 %v1221_v6, 272 }
 0x380   : > { %1227 = vbcast.lane.b32.xlu1 %v1221_v6, 264 }
 0x384   : > { %1235 = vbcast.lane.b32.xlu1 %v1221_v6, 280 }
 0x3e6   : > { %v1209_v8 = vpop.permute.xlu1 %1208  ;;  %v1205_v9 = vpop.permute.xlu0 %1204 }
 0x3e7   : > { %v1239_v62 = vmul.f32 %v1209_v8, %v2259_v2  ;;  %v1240_v13 = vmul.f32 %v1209_v8, %v2262_v3  ;;  %v1237_v14 = vmul.f32 %v1205_v9, %v2265_v4  ;;  %v1238_v50 = vmul.f32 %v1205_v9, %v2268_v5 }
 0x3e9   : > { %1255 = vst [vmem:[%s2357_s18 + $0x10] sm:$0xff] %v1239_v62  ;;  %1256 = vst [vmem:[%s2357_s18 + $0x18] sm:$0xff] %v1240_v13 }
 0x3ea   : > { %1253 = vst [vmem:[%s2357_s18] sm:$0xff] %v1237_v14  ;;  %1254 = vst [vmem:[%s2357_s18 + $0x8] sm:$0xff] %v1238_v50  ;;  %v1213_v56 = vpop.permute.xlu1 %1212  ;;  %v1224_v2 = vpop.permute.xlu0 %1223 }
 0x3eb   : > { %v1241_v3 = vmul.f32 %v1213_v56, %v2283_v48  ;;  %v1242_v4 = vmul.f32 %v1213_v56, %v2286_v61  ;;  %v1245_v5 = vmul.f32 %v1224_v2, %v2277_v10  ;;  %v1246_v7 = vmul.f32 %v1224_v2, %v2280_v51 }
 0x3ed   : > { %1257 = vst [vmem:[%s2357_s18 + $0x20] sm:$0xff] %v1241_v3  ;;  %1258 = vst [vmem:[%s2357_s18 + $0x28] sm:$0xff] %v1242_v4 }
 0x3ee   : > { %1261 = vst [vmem:[%s2357_s18 + $0x40] sm:$0xff] %v1245_v5  ;;  %1262 = vst [vmem:[%s2357_s18 + $0x48] sm:$0xff] %v1246_v7  ;;  %v1217_v15 = vpop.permute.xlu1 %1216  ;;  %v1232_v17 = vpop.permute.xlu0 %1231 }
 0x3ef   : > { %v1243_v48 = vmul.f32 %v1217_v15, %v2301_v52  ;;  %v1244_v18 = vmul.f32 %v1217_v15, %v2306_v16  ;;  %v1249_v61 = vmul.f32 %v1232_v17, %v2309_v12  ;;  %v1250_v10 = vmul.f32 %v1232_v17, %v2312_v54 }
 0x3f1   : > { %1259 = vst [vmem:[%s2357_s18 + $0x30] sm:$0xff] %v1243_v48  ;;  %1260 = vst [vmem:[%s2357_s18 + $0x38] sm:$0xff] %v1244_v18 }
 0x3f2   : > { %1265 = vst [vmem:[%s2357_s18 + $0x60] sm:$0xff] %v1249_v61  ;;  %1266 = vst [vmem:[%s2357_s18 + $0x68] sm:$0xff] %v1250_v10  ;;  %v1228_v51 = vpop.permute.xlu1 %1227 }
 0x3f3   : > { %v1247_v41 = vmul.f32 %v1228_v51, %v2293_v11  ;;  %v1248_v55 = vmul.f32 %v1228_v51, %v2296_v53 }
 0x3f5   : > { %1263 = vst [vmem:[%s2357_s18 + $0x50] sm:$0xff] %v1247_v41  ;;  %1264 = vst [vmem:[%s2357_s18 + $0x58] sm:$0xff] %v1248_v55 }
 0x3f6   : > { %v1236_v52 = vpop.permute.xlu1 %1235 }
 0x3f7   : > { %v1251_v11 = vmul.f32 %v1236_v52, %v2319_v19  ;;  %v1252_v16 = vmul.f32 %v1236_v52, %v2322_v58 }
 0x3f9   : > { %1267 = vst [vmem:[%s2357_s18 + $0x70] sm:$0xff] %v1251_v11  ;;  %1268 = vst [vmem:[%s2357_s18 + $0x78] sm:$0xff] %v1252_v16 }
 0x3fa   : > { %1825 = shalt.err (!%p1822_p4)
}
 0x3fb   : > { %s1826_s15 = scalar_lea.hbm %s2388_s7, 2048  ;;  %s1830_s30 = scalar_lea.hbm %s2443_s6, 8192 }
 0x3fc   : > { %p1827_p9 = scmp.ne.s32.totalorder %s2388_s7, %s1826_s15  ;;  %p1831_p8 = scmp.lt.u32.totalorder %s2388_s7, %s2443_s6 }
 0x3fd   : > { %p1832_p12 = scmp.lt.u32.totalorder %s1830_s30, %s1826_s15  ;;  %p1834_p0 = scmp.lt.u32.totalorder %s1826_s15, %s2388_s7 }
 0x3fe   : > { %p1828_p13 = pnand %p1827_p9, %p2094_p5 }
 0x3ff   : > { %p1833_p6 = por %p1832_p12, %p1831_p8 }
 0x400   : > { %p1829_p10 = pneg %p1828_p13 }
 0x401   : > { %p1835_p3 = por %p1834_p0, %p1833_p6 }
 0x403   : > { %p1836_p7 = pnand %p1835_p3, %p1829_p10 }
 0x405   : > { %1839 = shalt.err (!%p1836_p7)
}
 0x406   : > { %s1901_s20 = smov 256   ;;  %s1902_s14 = smov 16  }
 0x407   : > { %1517 = dma.vmem_to_hbm [thread:$0]  (%p2094_p5), %s2390_s21, 2048, %s2388_s7, %s1270_s3, %s1901_s20, %s1901_s20, %s1902_s14  }
 0x408 PF: > { %p1544_p11 = scmp.ge.s32.totalorder %s1886_s26, 2  ;;  %s1299_s27 = sand.u32 1, %s1874_s23  }
 0x409   : > { %p2461_p1 = scmp.ne.s32.totalorder %s2448_s29, 0  ;;  %s1300_s17 = scalar_lea.sflag [#allocation5], %s1299_s27 }
 0x40b   : > { %p1534_p2 = pnand %p1544_p11, %p2461_p1 }
 0x40d   : > { %1869 = dma.done.wait (!%p1534_p2), %s1300_s17, 2048  }
 0x40e   : > { %1871 = vsyncadd (!%p1534_p2), %s1300_s17, 4294965248  ;;  %p22_p4 = scmp.ge.s32.totalorder %s2080_s19, 6   ;;  %s2462_s23 = smov %s1878_s24 }
 0x40f   : > { %s2463_s24 = smov %s1882_s25  ;;  %s2464_s25 = smov %s2090_s10 }
 0x410   : > { %s2465_s26 = smov %s2080_s19  ;;  %24 = sbr.rel (!%p22_p4) target bundleno = 9 (0x9), region = 101 }
 0x417   :  { %1305 = vsyncpa [#allocation4], 1 }
 0x418   :  { %1307 = vsyncpa [#allocation4 + $0x1], 1 }
 0x419   :  { %1308 = vsyncpa [#allocation7], 1 }
 0x41a   :  { %1309 = vsyncpa [#allocation10], 1 }
 0x41b   :  { %1310 = vsyncpa [#allocation5], 1 }
 0x41c   :  { %1312 = vsyncpa [#allocation5 + $0x1], 1 }

</bundles_post_ra>
